<compile_context>
chip_gen: v7x
topology: tpu7x:2x2x1
jax: 0.10.0
libtpu: 0.0.40
codegen_flags: <defaults>
</compile_context>

<pallas_src>
import math
import functools

import jax
import jax.numpy as jnp
from jax.experimental import pallas as pl
from jax.experimental.pallas import tpu as pltpu


def _chip_tuning():
    """(vmem_limit_bytes, max attention q tile) per TPU generation."""
    try:
        kind = jax.devices()[0].device_kind.lower()
    except Exception:
        kind = ""
    if "7" in kind:                        # v7x: 64 MiB VMEM / TensorCore, 256-deep MXU
        return 44 * 1024 * 1024, 256
    if "v6" in kind:                       # v6e: 128 MiB VMEM, 256-deep MXU
        return 100 * 1024 * 1024, 256
    if "v5" in kind:                       # v5e: 128 MiB VMEM, 128-deep MXU
        return 100 * 1024 * 1024, 128
    return 44 * 1024 * 1024, 128           # unknown: conservative


_VMEM_LIMIT, _TQ_MAX = _chip_tuning()


# ----------------------------------------------------------------------------
# Kernel 1: self-attention AND cross-attention in one call.
#   grid = (2, B, N // tq);  axis 0 selects self (kv = x) vs cross (kv = ref_x).
#   k == v in this module, so a single KV operand is loaded; q = kv[0] (= x).
# ----------------------------------------------------------------------------
def _attention_pair_kernel(q_ref, kv_ref, o_ref, attn_ref, *, scale):
    q = q_ref[0, 0]                                          # (tq, D) bf16
    kv = kv_ref[0, 0]                                        # (N, D)  bf16 (k == v)
    s = jax.lax.dot_general(q, kv, (((1,), (1,)), ((), ())),
                            preferred_element_type=jnp.float32) * scale  # (tq, N) f32
    m = jnp.max(s, axis=-1, keepdims=True)
    e = jnp.exp(s - m)
    denom = jnp.sum(e, axis=-1, keepdims=True)
    attn = e * pl.reciprocal(denom, approx=True)             # divide on the EUP slot
    # NOTE: approx reciprocal + bf16 storage -> exported maps sum to 1 only to ~1e-3.
    p16 = attn.astype(jnp.bfloat16)
    attn_ref[0, 0] = p16
    o_ref[0, 0] = jnp.dot(p16, kv,
                          preferred_element_type=jnp.float32).astype(jnp.bfloat16)


def attention_pair(x, ref_x):
    """Returns (self_out, self_attn, cross_out, cross_attn), all bf16."""
    B, N, D = x.shape
    tq = N if N <= _TQ_MAX else _TQ_MAX
    assert N % tq == 0
    kv = jnp.stack([x, ref_x], axis=0).astype(jnp.bfloat16)  # (2,B,N,D); kv[0] doubles as q

    out, attn = pl.pallas_call(
        functools.partial(_attention_pair_kernel, scale=1.0 / math.sqrt(D)),
        out_shape=(jax.ShapeDtypeStruct((2, B, N, D), jnp.bfloat16),
                   jax.ShapeDtypeStruct((2, B, N, N), jnp.bfloat16)),
        grid=(2, B, N // tq),
        in_specs=[pl.BlockSpec((1, 1, tq, D), lambda s, b, qi: (0, b, qi, 0)),  # q = x
                  pl.BlockSpec((1, 1, N, D), lambda s, b, qi: (s, b, 0, 0))],   # kv
        out_specs=(pl.BlockSpec((1, 1, tq, D), lambda s, b, qi: (s, b, qi, 0)),
                   pl.BlockSpec((1, 1, tq, N), lambda s, b, qi: (s, b, qi, 0))),
        compiler_params=pltpu.CompilerParams(
            dimension_semantics=("parallel", "parallel", "parallel"),
            vmem_limit_bytes=_VMEM_LIMIT),
    )(kv, kv)
    return out[0], attn[0], out[1], attn[1]


# ----------------------------------------------------------------------------
# In-kernel helpers
# ----------------------------------------------------------------------------
def _layernorm(v, g, b, eps=1e-5):
    mu = jnp.mean(v, axis=-1, keepdims=True)
    var = jnp.mean(jnp.square(v - mu), axis=-1, keepdims=True)
    return (v - mu) * jax.lax.rsqrt(var + eps) * g + b


def _median_lower(a, k):
    """Exact k-th order statistic (0-indexed) per column of `a` ((N, F) f32).

    32-step MSB-first radix select on an order-preserving integer key of the
    f32 bit pattern: ~32 (N,F) passes instead of N, exact (same tie handling /
    lower-median semantics as sorting, never rounded)."""
    n, f = a.shape
    i32 = pltpu.bitcast(a, jnp.int32)
    sign_bit = jnp.int32(-2 ** 31)
    # monotone (unsigned bit-order) key: negatives -> ~i, non-negatives -> i ^ 0x80000000
    ukey = jnp.where(i32 < 0, jnp.bitwise_not(i32), i32 ^ sign_bit)

    def body(t, carry):
        group, gsize, rank, prefix = carry
        bitmask = jnp.left_shift(jnp.int32(1), jnp.int32(31) - t)
        has_bit = (jnp.bitwise_and(ukey, bitmask) != 0).astype(jnp.float32)
        gh = group * has_bit                               # group members with the bit set
        c1 = jnp.sum(gh, axis=0, keepdims=True)            # (1, F)
        c0 = gsize - c1
        take_one = rank >= c0                              # (1, F) bool
        group = jnp.where(take_one, gh, group - gh)
        gsize = jnp.where(take_one, c1, c0)
        rank = jnp.where(take_one, rank - c0, rank)
        prefix = jnp.where(take_one, prefix | bitmask, prefix)
        return group, gsize, rank, prefix

    init = (jnp.ones((n, f), jnp.float32),
            jnp.full((1, f), jnp.float32(n)),
            jnp.full((1, f), jnp.float32(k)),
            jnp.zeros((1, f), jnp.int32))
    _, _, _, prefix = jax.lax.fori_loop(0, 32, body, init)
    med_i = jnp.where(prefix >= 0, jnp.bitwise_not(prefix), prefix ^ sign_bit)
    return pltpu.bitcast(med_i, jnp.float32)               # (1, F)


# ----------------------------------------------------------------------------
# Kernel 2: residuals + FeatureFusion + LayerNorm1 + fc1 + DWConv + GELU +
#           lower-median + scaling + fc2 + residual + LayerNorm2, fully fused.
#           One batch element per grid step (dwconv / median need the whole
#           token grid); all (N,F) intermediates stay in VMEM.
# TODO(synk): grid=(B,) leaves one TensorCore idle on v7x when B == 1.
# ----------------------------------------------------------------------------
def _encoder_ffn_kernel(x_ref, sa_ref, ca_ref, wA_ref, wB_ref, pf_ref, pd_ref,
                        o_ref, *, H, W, D, k_med):
    N = H * W
    x = x_ref[0]                                            # (N, D) f32

    # residuals (dropout = identity in eval mode)
    new_x = (x + sa_ref[0].astype(jnp.float32)).astype(jnp.bfloat16)
    ref_x = (x + ca_ref[0].astype(jnp.float32)).astype(jnp.bfloat16)

    pf = pf_ref[...]                                        # (13, F) f32
    pd = pd_ref[...]                                        # (6, D)  f32
    taps = pf[0:9]                                          # dwconv taps, index kh*3+kw
    fus_b1, fc1_b = pf[9:10], pf[10:11]
    dw_b, scaling = pf[11:12], pf[12:13]
    fus_b2 = pd[0:1]
    ln1_g, ln1_b = pd[1:2], pd[2:3]
    fc2_b = pd[3:4]
    ln2_g, ln2_b = pd[4:5], pd[5:6]

    # FeatureFusion: Linear(cat([new_x, ref_x], -1)) -> ReLU -> Linear.
    # Single K=2D MXU pass when the lane-concat is free (D % 128 == 0).
    if D % 128 == 0:
        cat = jnp.concatenate([new_x, ref_x], axis=-1)
        h = jnp.dot(cat, wA_ref[pl.ds(0, 2 * D), :],
                    preferred_element_type=jnp.float32) + fus_b1
    else:
        h = (jnp.dot(new_x, wA_ref[pl.ds(0, D), :], preferred_element_type=jnp.float32)
             + jnp.dot(ref_x, wA_ref[pl.ds(D, D), :], preferred_element_type=jnp.float32)
             + fus_b1)
    h = jnp.maximum(h, 0.0)
    fused = jnp.dot(h.astype(jnp.bfloat16), wB_ref[0],
                    preferred_element_type=jnp.float32) + fus_b2

    # norm1
    x1 = _layernorm(fused, ln1_g, ln1_b)

    # Mlp.fc1
    h1 = jnp.dot(x1.astype(jnp.bfloat16), wA_ref[pl.ds(2 * D, D), :],
                 preferred_element_type=jnp.float32) + fc1_b          # (N, F)

    # depthwise 3x3 conv (stride 1, pad 1, groups=C) on the H x W token grid.
    # Token-axis rolls on the XLU + shared row/column edge masks; the centre
    # tap is mask-free and carries the conv bias.
    n_idx = jax.lax.broadcasted_iota(jnp.int32, (N, 1), 0)
    row = n_idx // W
    col = n_idx % W
    up = pltpu.roll(h1, shift=W % N, axis=0) * (row >= 1).astype(jnp.float32)        # dh=-1
    dn = pltpu.roll(h1, shift=(-W) % N, axis=0) * (row <= H - 2).astype(jnp.float32)  # dh=+1
    cm_l = (col >= 1).astype(jnp.float32)                   # dw = -1 valid
    cm_r = (col <= W - 2).astype(jnp.float32)               # dw = +1 valid

    def tap(kh, kw):
        i = kh * 3 + kw
        return taps[i:i + 1, :]                             # (1, F)

    acc = h1 * tap(1, 1) + dw_b                             # centre tap + bias
    for dh, src in ((-1, up), (0, h1), (1, dn)):
        kh = dh + 1
        if dh != 0:
            acc = acc + src * tap(kh, 1)                                        # dw = 0
        acc = acc + (pltpu.roll(src, shift=1, axis=0) * cm_l) * tap(kh, 0)      # dw = -1
        acc = acc + (pltpu.roll(src, shift=N - 1, axis=0) * cm_r) * tap(kh, 2)  # dw = +1

    # Mlp.act
    a = jax.nn.gelu(acc, approximate=True)                  # (N, F) f32

    # torch.median(dim=1) lower median (exact, 32-step radix select)
    med = _median_lower(a, k_med)                           # (1, F)
    a = a + scaling * med

    # Mlp.fc2
    y = jnp.dot(a.astype(jnp.bfloat16), wB_ref[1],
                preferred_element_type=jnp.float32) + fc2_b

    # residual + norm2
    o_ref[0] = _layernorm(x1 + y, ln2_g, ln2_b)


# ----------------------------------------------------------------------------
# Parameter init (deterministic, synthetic), packed into 4 arrays:
#   wA (3D, F) bf16 : [FeatureFusion Linear(2D->F) weight ; Mlp.fc1 (D->F) weight]
#   wB (2, F, D) bf16: [FeatureFusion Linear(F->D) weight , Mlp.fc2 (F->D) weight]
#   pf (13, F) f32  : rows 0-8 dwconv taps (kh*3+kw), 9 fus_b1, 10 fc1_b, 11 dw_b, 12 scaling
#   pd (6, D) f32   : 0 fus_b2, 1 ln1_g, 2 ln1_b, 3 fc2_b, 4 ln2_g, 5 ln2_b
# ----------------------------------------------------------------------------
def init_params(key, d_model, d_ff):
    ks = jax.random.split(key, 5)

    def w(k, shape, scale=0.05):
        return jax.random.normal(k, shape, jnp.float32) * scale

    wA = jnp.concatenate([w(ks[0], (2 * d_model, d_ff)),      # fusion fc[0]
                          w(ks[1], (d_model, d_ff))],         # Mlp.fc1
                         axis=0).astype(jnp.bfloat16)
    wB = jnp.stack([w(ks[2], (d_ff, d_model)),                # fusion fc[2]
                    w(ks[3], (d_ff, d_model))],               # Mlp.fc2
                   axis=0).astype(jnp.bfloat16)
    pf = jnp.concatenate([w(ks[4], (9, d_ff), scale=0.1),     # dwconv taps
                          jnp.zeros((3, d_ff), jnp.float32),  # fus_b1, fc1_b, dw_b
                          jnp.ones((1, d_ff), jnp.float32)],  # scaling
                         axis=0)
    pd = jnp.concatenate([jnp.zeros((1, d_model), jnp.float32),   # fus_b2
                          jnp.ones((1, d_model), jnp.float32),    # ln1_g
                          jnp.zeros((1, d_model), jnp.float32),   # ln1_b
                          jnp.zeros((1, d_model), jnp.float32),   # fc2_b
                          jnp.ones((1, d_model), jnp.float32),    # ln2_g
                          jnp.zeros((1, d_model), jnp.float32)],  # ln2_b
                         axis=0)
    return dict(wA=wA, wB=wB, pf=pf, pd=pd)


# ----------------------------------------------------------------------------
# EncoderLayer forward (with_intra=True, with_inter=True path)
# ----------------------------------------------------------------------------
def encoder_layer_forward(p, x, ref_x):
    B, N, D = x.shape
    F = p["pf"].shape[1]
    H = W = int(math.sqrt(N))
    assert H * W == N, "token count must be a perfect square (H = W = sqrt(N))"

    # attention (injected modules in the PyTorch code -> plain SDPA here);
    # self- and cross-attention computed by one pallas_call.
    sa_out, intra_corr, ca_out, inter_corr = attention_pair(x, ref_x)
    intra_target, inter_target = x, ref_x                   # values of each attention

    seq_spec = pl.BlockSpec((1, N, D), lambda b: (b, 0, 0))

    out = pl.pallas_call(
        functools.partial(_encoder_ffn_kernel, H=H, W=W, D=D, k_med=(N - 1) // 2),
        out_shape=jax.ShapeDtypeStruct((B, N, D), jnp.float32),
        grid=(B,),
        in_specs=[seq_spec, seq_spec, seq_spec,
                  pl.BlockSpec((3 * D, F), lambda b: (0, 0)),
                  pl.BlockSpec((2, F, D), lambda b: (0, 0, 0)),
                  pl.BlockSpec((13, F), lambda b: (0, 0)),
                  pl.BlockSpec((6, D), lambda b: (0, 0))],
        out_specs=seq_spec,
        compiler_params=pltpu.CompilerParams(
            dimension_semantics=("parallel",),
            vmem_limit_bytes=_VMEM_LIMIT),
    )(x, sa_out, ca_out, p["wA"], p["wB"], p["pf"], p["pd"])

    return out, intra_corr, intra_target, inter_corr, inter_target


if __name__ == "__main__":
    B, N, D = 2, 16, 32          # batch=2, seq=16 (H=W=4), d_model=32
    F = 4 * D                    # d_feed_forward default = 4 * d_model

    key = jax.random.PRNGKey(0)
    k_in, k_ref, k_par = jax.random.split(key, 3)
    x = jax.random.normal(k_in, (B, N, D), jnp.float32)
    ref_x = jax.random.normal(k_ref, (B, N, D), jnp.float32)
    params = init_params(k_par, D, F)

    out, intra_corr, intra_target, inter_corr, inter_target = encoder_layer_forward(
        params, x, ref_x)
    jax.block_until_ready(out)

    assert out.shape == (B, N, D)
    assert intra_corr.shape == (B, N, N) and inter_corr.shape == (B, N, N)
    assert intra_target.shape == (B, N, D) and inter_target.shape == (B, N, D)
    assert bool(jnp.all(jnp.isfinite(out)))
    assert bool(jnp.all(jnp.isfinite(intra_corr))) and bool(jnp.all(jnp.isfinite(inter_corr)))
    print("KERNEL_OK")
</pallas_src>

<mosaic_0001>
module attributes {stable_mosaic.version = 11 : i64} {
  func.func @_attention_pair_kernel(%arg0: i32, %arg1: i32, %arg2: i32, %arg3: memref<1x1x16x32xbf16, #tpu.memory_space<vmem>>, %arg4: memref<1x1x16x32xbf16, #tpu.memory_space<vmem>>, %arg5: memref<1x1x16x32xbf16, #tpu.memory_space<vmem>>, %arg6: memref<1x1x16x16xbf16, #tpu.memory_space<vmem>>) attributes {dimension_semantics = [#tpu.dimension_semantics<parallel>, #tpu.dimension_semantics<parallel>, #tpu.dimension_semantics<parallel>], iteration_bounds = array<i64: 2, 2, 1>, scalar_prefetch = 0 : i64, scratch_operands = 0 : i64, tpu.core_type = #tpu.core_type<tc>, window_params = [{transform_indices = @transform_0, window_bounds = array<i64: 1, 1, 16, 32>}, {transform_indices = @transform_1, window_bounds = array<i64: 1, 1, 16, 32>}, {transform_indices = @transform_2, window_bounds = array<i64: 1, 1, 16, 32>}, {transform_indices = @transform_3, window_bounds = array<i64: 1, 1, 16, 16>}]} {
    %c0 = arith.constant 0 : index
    %c0_0 = arith.constant 0 : index
    %c0_1 = arith.constant 0 : index
    %c0_2 = arith.constant 0 : index
    %0 = vector.load %arg3[%c0, %c0_0, %c0_1, %c0_2] : memref<1x1x16x32xbf16, #tpu.memory_space<vmem>>, vector<1x1x16x32xbf16>
    %1 = vector.shape_cast %0 : vector<1x1x16x32xbf16> to vector<16x32xbf16>
    %c0_3 = arith.constant 0 : index
    %c0_4 = arith.constant 0 : index
    %c0_5 = arith.constant 0 : index
    %c0_6 = arith.constant 0 : index
    %2 = vector.load %arg4[%c0_3, %c0_4, %c0_5, %c0_6] : memref<1x1x16x32xbf16, #tpu.memory_space<vmem>>, vector<1x1x16x32xbf16>
    %3 = vector.shape_cast %2 : vector<1x1x16x32xbf16> to vector<16x32xbf16>
    %cst = arith.constant dense<0.000000e+00> : vector<16x16xf32>
    %4 = tpu.matmul %1, %3, %cst {dimension_numbers = #tpu.dot_dimension_numbers<[1], [1], [0], [0], [0, 0, 1, 0], [], []>} : vector<16x32xbf16>, vector<16x32xbf16>, vector<16x16xf32> -> vector<16x16xf32>
    %cst_7 = arith.constant 0.176776692 : f32
    %5 = vector.broadcast %cst_7 : f32 to vector<16x16xf32>
    %6 = arith.mulf %4, %5 : vector<16x16xf32>
    %cst_8 = arith.constant dense<0xFF800000> : vector<16xf32>
    %7 = vector.multi_reduction <maximumf>, %6, %cst_8 [1] : vector<16x16xf32> to vector<16xf32>
    %8 = vector.shape_cast %7 : vector<16xf32> to vector<16x1xf32>
    %9 = vector.broadcast %8 : vector<16x1xf32> to vector<16x16xf32>
    %10 = arith.subf %6, %9 : vector<16x16xf32>
    %11 = math.exp %10 : vector<16x16xf32>
    %cst_9 = arith.constant dense<0.000000e+00> : vector<16xf32>
    %12 = vector.multi_reduction <add>, %11, %cst_9 [1] : vector<16x16xf32> to vector<16xf32>
    %13 = vector.shape_cast %12 : vector<16xf32> to vector<16x1xf32>
    %14 = tpu.reciprocal %13 {approx = true} : vector<16x1xf32> -> vector<16x1xf32>
    %15 = vector.broadcast %14 : vector<16x1xf32> to vector<16x16xf32>
    %16 = arith.mulf %11, %15 : vector<16x16xf32>
    %17 = arith.truncf %16 : vector<16x16xf32> to vector<16x16xbf16>
    %c0_10 = arith.constant 0 : index
    %c0_11 = arith.constant 0 : index
    %c0_12 = arith.constant 0 : index
    %c0_13 = arith.constant 0 : index
    %18 = vector.load %arg6[%c0_10, %c0_11, %c0_12, %c0_13] : memref<1x1x16x16xbf16, #tpu.memory_space<vmem>>, vector<1x1x16x16xbf16>
    %19 = vector.shape_cast %18 : vector<1x1x16x16xbf16> to vector<16x16xbf16>
    %20 = vector.shape_cast %17 : vector<16x16xbf16> to vector<1x1x16x16xbf16>
    tpu.vector_store %arg6[%c0_10, %c0_11, %c0_12, %c0_13], %20 {strides = array<i32>} : memref<1x1x16x16xbf16, #tpu.memory_space<vmem>>, vector<1x1x16x16xbf16>,
    %cst_14 = arith.constant dense<0.000000e+00> : vector<16x32xf32>
    %21 = tpu.matmul %17, %3, %cst_14 {dimension_numbers = #tpu.dot_dimension_numbers<[1], [0], [0], [1], [0, 0, 1, 1], [], []>} : vector<16x16xbf16>, vector<16x32xbf16>, vector<16x32xf32> -> vector<16x32xf32>
    %22 = arith.truncf %21 : vector<16x32xf32> to vector<16x32xbf16>
    %c0_15 = arith.constant 0 : index
    %c0_16 = arith.constant 0 : index
    %c0_17 = arith.constant 0 : index
    %c0_18 = arith.constant 0 : index
    %23 = vector.load %arg5[%c0_15, %c0_16, %c0_17, %c0_18] : memref<1x1x16x32xbf16, #tpu.memory_space<vmem>>, vector<1x1x16x32xbf16>
    %24 = vector.shape_cast %23 : vector<1x1x16x32xbf16> to vector<16x32xbf16>
    %25 = vector.shape_cast %22 : vector<16x32xbf16> to vector<1x1x16x32xbf16>
    tpu.vector_store %arg5[%c0_15, %c0_16, %c0_17, %c0_18], %25 {strides = array<i32>} : memref<1x1x16x32xbf16, #tpu.memory_space<vmem>>, vector<1x1x16x32xbf16>,
    return
  }
  func.func @transform_0(%arg0: i32, %arg1: i32, %arg2: i32) -> (i32, i32, i32, i32) {
    %c0_i32 = arith.constant 0 : i32
    %c0_i32_0 = arith.constant 0 : i32
    %c0_i32_1 = arith.constant 0 : i32
    return %c0_i32, %arg1, %arg2, %c0_i32_0 : i32, i32, i32, i32
  }
  func.func @transform_1(%arg0: i32, %arg1: i32, %arg2: i32) -> (i32, i32, i32, i32) {
    %c0_i32 = arith.constant 0 : i32
    %c0_i32_0 = arith.constant 0 : i32
    %c0_i32_1 = arith.constant 0 : i32
    return %arg0, %arg1, %c0_i32, %c0_i32_0 : i32, i32, i32, i32
  }
  func.func @transform_2(%arg0: i32, %arg1: i32, %arg2: i32) -> (i32, i32, i32, i32) {
    %c0_i32 = arith.constant 0 : i32
    %c0_i32_0 = arith.constant 0 : i32
    return %arg0, %arg1, %arg2, %c0_i32 : i32, i32, i32, i32
  }
  func.func @transform_3(%arg0: i32, %arg1: i32, %arg2: i32) -> (i32, i32, i32, i32) {
    %c0_i32 = arith.constant 0 : i32
    %c0_i32_0 = arith.constant 0 : i32
    return %arg0, %arg1, %arg2, %c0_i32 : i32, i32, i32, i32
  }
}

</mosaic_0001>

<bundles_post_ra>
// kernel: tpu_custom_call.1
= control target key start
LH: loop header
LB: loop body
LE: loop exit
PB: predicated region body
PF: predicated region fallthrough
CT: control target
= control target key end

     0   :  { %s1445_s0 = inlined_call_operand.hbm [shape: bf16[2,2,16,32], index: 0, kind: input, shape index: {}]   ;;  %s1446_s1 = inlined_call_operand.hbm [shape: bf16[2,2,16,32], index: 1, kind: input, shape index: {}]   ;;  %s1447_s2 = inlined_call_operand.hbm [shape: bf16[2,2,16,32], index: 2, kind: output, shape index: {0}]   ;;  %s1448_s3 = inlined_call_operand.hbm [shape: bf16[2,2,16,16], index: 3, kind: output, shape index: {1}]  }
   0x1   :  { %1463 = sst [smem:[#allocation19_spill]] %s1445_s0 }
   0x2   :  { %1464 = sst [smem:[#allocation20_spill]] %s1447_s2 }
   0x3   :  { %9 = vsyncpa [#allocation3], 0 }
   0x4   :  { %11 = vsyncpa [#allocation3 + $0x1], 0 }
   0x5   :  { %12 = vsyncpa [#allocation6], 0 }
   0x6   :  { %14 = vsyncpa [#allocation6 + $0x1], 0 }
   0x7   :  { %15 = vsyncpa [#allocation4], 0 }
   0x8   :  { %17 = vsyncpa [#allocation4 + $0x1], 0 }
   0x9   :  { %18 = vsyncpa [#allocation9], 0 }
   0xa   :  { %20 = vsyncpa [#allocation9 + $0x1], 0  ;;  %s1067_s12 = smov 0   ;;  %s1069_s13 = smov 0  }
   0xb   :  { %s1071_s14 = smov 0   ;;  %s1073_s15 = smov 0  }
   0xc   :  { %s1075_s16 = smov 0   ;;  %s1077_s17 = smov 0  }
   0xd   :  { %s1079_s18 = smov 0   ;;  %s1081_s19 = smov 0  }
   0xe   :  { %s1083_s20 = smov 0   ;;  %s1085_s21 = smov 0  }
   0xf   :  { %s1087_s22 = smov 0  }
  0x10 LB: > { %1465 = sst [smem:[#allocation14_spill]] %s995_s12  ;;  %s1449_s23 = sadd.s32 4294967295, %s1035_s22   ;;  %s1035_s22 = sphi %s1087_s22, %s26_s22   ;;  %s1031_s21 = sphi %s1085_s21, %s1506_s21   ;;  %s1027_s20 = sphi %s1083_s20, %s1505_s20   ;;  %s1023_s19 = sphi %s1081_s19, %s1504_s19   ;;  %s1019_s18 = sphi %s1079_s18, %s1503_s18   ;;  %s1015_s17 = sphi %s1077_s17, %s1495_s17   ;;  %s1011_s16 = sphi %s1075_s16, %s1502_s16   ;;  %s1007_s15 = sphi %s1073_s15, %s1501_s15   ;;  %s1003_s14 = sphi %s1071_s14, %s1500_s14   ;;  %s999_s13 = sphi %s1069_s13, %s1499_s13   ;;  %s995_s12 = sphi %s1067_s12, %s1498_s12  }
  0x11   : > { %1466 = sst [smem:[#allocation15_spill]] %s1015_s17  ;;  %s41_s24 = sadd.s32 1, %s1027_s20 }
  0x12   : > { %p1122_p0 = scmp.ge.s32.totalorder %s41_s24, 2  ;;  %s54_s26 = sadd.s32 1, %s1015_s17 }
  0x13   : > { %p61_p1 = scmp.ne.s32.totalorder %s1015_s17, %s1011_s16  ;;  %p1451_p2 = scmp.eq.s32.totalorder %s1035_s22, 0 }
  0x14   : > { %s1508_s24 = smov (%p1122_p0, %s41_s24), 0  ;;  %p67_p4 = scmp.ne.s32.totalorder %s1011_s16, %s1007_s15 }
  0x15   : > { %1468 = sst [smem:[#allocation16_spill]] %s1508_s24  ;;  %p1136_p3 = por %p1451_p2, %p61_p1 }
  0x16   : > { %s1143_s28 = ssub.s32 %s1027_s20, %s1508_s24  ;;  %p1147_p5 = scmp.eq.s32.totalorder %s1449_s23, 0 }
  0x17   : > { %p52_p6 = scmp.eq.s32.totalorder %s1143_s28, 0  ;;  %p1450_p8 = scmp.lt.s32.totalorder %s1035_s22, 4 }
  0x18   : > { %s1470_s29 = scalar_select %p1147_p5, 1, 0 }
  0x19   : > { %p1154_p7 = por %p1147_p5, %p67_p4  ;;  %s179_s5 = sand.u32 1, %s1015_s17  }
  0x1a   : > { %s1160_s4 = scalar_select %p52_p6, %s1015_s17, %s54_s26  }
  0x1b   : > { %s1471_s30 = scalar_select %p1154_p7, 1, 0 }
  0x1c   : > { %1472 = sst [smem:[#allocation17_spill]] %s1160_s4  ;;  %s668_s6 = sshll.u32 %s1027_s20, 7 }
  0x1d   : > { %s638_s7 = sshll.u32 %s179_s5, 3  ;;  %s1473_s0 = sld [smem:[#allocation19_spill]] }
  0x1e   : > { %s183_s11 = scalar_lea.vmem [#allocation2], %s638_s7  ;;  %p1173_p9 = pnand %p1450_p8, %p1136_p3 }
  0x1f   : > { %s192_s15 = sshll.u32 %s183_s11, 4  ;;  %s1179_s26 = scalar_lea.sflag [#allocation3], %s179_s5  ;;  %s1177_s15 = int_to_ptr.vmem [resolvable:$true] %s192_s15 }
  0x20   : > { %p819_p11 = pneg %p1173_p9 }
  0x23   : > { %s1167_s10 = scalar_lea.hbm %s1473_s0, %s668_s6  ;;  %s822_s8 = scalar_lea.hbm %s1473_s0, 512 }
  0x24   : > { %s817_s6 = scalar_lea.hbm %s1167_s10, 128  ;;  %p823_p1 = scmp.lt.u32.totalorder %s1167_s10, %s1473_s0 }
  0x25   : > { %p818_p10 = scmp.ne.s32.totalorder %s1167_s10, %s817_s6  ;;  %p824_p3 = scmp.lt.u32.totalorder %s822_s8, %s817_s6 }
  0x26   : > { %p826_p6 = scmp.lt.u32.totalorder %s817_s6, %s1167_s10 }
  0x27   : > { %p820_p12 = pnand %p819_p11, %p818_p10  ;;  %p825_p4 = por %p824_p3, %p823_p1 }
  0x29   : > { %p821_p13 = pneg %p820_p12  ;;  %p827_p8 = por %p826_p6, %p825_p4 }
  0x2b   : > { %p828_p2 = pnand %p827_p8, %p821_p13 }
  0x2d   : > { %831 = shalt.err (!%p828_p2)
}
  0x2e   : > { %s832_s5 = scalar_lea.vmem %s1177_s15, 128  ;;  %s1037_s27 = smov [#allocation2]  }
  0x2f   : > { %p833_p10 = scmp.ne.s32.totalorder %s1177_s15, %s832_s5  ;;  %s837_s7 = sshll.u32 %s1037_s27, 4  ;;  %s838_s7 = int_to_ptr.vmem [resolvable:$false] %s837_s7 }
  0x30   : > { %s839_s9 = scalar_lea.vmem %s838_s7, 256  ;;  %p840_p5 = scmp.lt.s32.totalorder %s1177_s15, %s838_s7 }
  0x31   : > { %p835_p12 = pnand %p833_p10, %p819_p11  ;;  %p841_p1 = scmp.lt.s32.totalorder %s839_s9, %s832_s5 }
  0x33   : > { %p836_p7 = pneg %p835_p12  ;;  %p842_p3 = por %p841_p1, %p840_p5 }
  0x35   : > { %p843_p4 = pnand %p842_p3, %p836_p7 }
  0x37   : > { %846 = shalt.err (!%p843_p4)
}
  0x38   : > { %s1454_s6 = smov 64   ;;  %s1455_s8 = smov 4  }
  0x39   : > { %700 = dma.hbm_to_vmem [thread:$0]  (!%p1173_p9), %s1167_s10, 128, %s1177_s15, %s1179_s26, %s1454_s6, %s1454_s6, %s1455_s8  }
  0x3a   : > { %p645_p2 = scmp.ge.s32.totalorder %s1035_s22, 1  ;;  %p223_p5 = scmp.lt.s32.totalorder %s1035_s22, 5 }
  0x3b   : > { %s635_s5 = sadd.s32 4294967294, %s1035_s22   ;;  %s45_s27 = sadd.s32 1, %s1031_s21 }
  0x3c   : > { %p1212_p7 = pnand %p645_p2, %p223_p5  ;;  %s82_s7 = sadd.s32 1, %s1003_s14 }
  0x3d   : > { %s1510_s27 = smov (!%p1122_p0, %s45_s27), %s1031_s21  ;;  %p89_p8 = scmp.ne.s32.totalorder %s1003_s14, %s999_s13 }
  0x3e   : > { %p95_p11 = scmp.ne.s32.totalorder %s999_s13, %s995_s12  ;;  %p47_p9 = scmp.ge.s32.totalorder %s1510_s27, 2 }
  0x3f   : > { %s1476_s23 = sadd.s32 4294967295, %s1035_s22   ;;  %p1477_p6 = scmp.eq.s32.totalorder %s1035_s22, 0 }
  0x40   : > { %p123_p13 = scmp.eq.s32.totalorder %s1476_s23, 3  ;;  %p1479_p12 = scmp.ne.s32.totalorder %s1470_s29, 0 }
  0x41   : > { %p1230_p10 = por %p89_p8, %p1477_p6  ;;  %s1512_s27 = smov (%p47_p9, %s1510_s27), 0 }
  0x42   : > { %p1236_p1 = por %p95_p11, %p1479_p12  ;;  %1481 = sst [smem:[#allocation18_spill]] %s1512_s27 }
  0x43   : > { %p1242_p0 = por %p123_p13, %p89_p8  ;;  %p129_p3 = scmp.eq.s32.totalorder %s635_s5, 3 }
  0x44   : > { %s1480_s15 = scalar_select %p1236_p1, 1, 0 }
  0x45   : > { %s1482_s25 = scalar_select %p1242_p0, 1, 0 }
  0x46   : > { %s77_s26 = ssub.s32 %s1031_s21, %s1512_s27  ;;  %s202_s9 = sand.u32 1, %s1003_s14  }
  0x47   : > { %s79_s23 = sor.u32 %s77_s26, %s1143_s28  ;;  %p1250_p4 = por %p129_p3, %p95_p11 }
  0x48   : > { %p80_p2 = scmp.eq.s32.totalorder %s79_s23, 0  ;;  %s641_s29 = sshll.u32 %s202_s9, 3 }
  0x49   : > { %s1483_s6 = scalar_select %p1250_p4, 1, 0 }
  0x4a   : > { %s642_s8 = sshll.u32 %s1027_s20, 1  ;;  %s643_s24 = sshll.u32 %s1031_s21, 2 }
  0x4b   : > { %s1256_s0 = scalar_select %p80_p2, %s1003_s14, %s82_s7  }
  0x4c   : > { %s212_s4 = sadd.s32 %s643_s24, %s642_s8  ;;  %s206_s17 = scalar_lea.vmem [#allocation5], %s641_s29 }
  0x4d   : > { %s215_s12 = sshll.u32 %s206_s17, 4  ;;  %s644_s2 = sshll.u32 %s212_s4, 6  ;;  %s1259_s12 = int_to_ptr.vmem [resolvable:$true] %s215_s12 }
  0x4e   : > { %s1264_s28 = scalar_lea.hbm %s1446_s1, %s644_s2  ;;  %p1484_p5 = scmp.lt.s32.totalorder %s1035_s22, 4 }
  0x4f   : > { %s1274_s17 = scalar_lea.sflag [#allocation6], %s202_s9  ;;  %s847_s24 = scalar_lea.hbm %s1264_s28, 128 }
  0x50   : > { %p1270_p8 = pnand %p1484_p5, %p1230_p10  ;;  %p848_p11 = scmp.ne.s32.totalorder %s1264_s28, %s847_s24 }
  0x51   : > { %s852_s8 = scalar_lea.hbm %s1446_s1, 512  ;;  %p853_p10 = scmp.lt.u32.totalorder %s1264_s28, %s1446_s1 }
  0x52   : > { %p849_p9 = pneg %p1270_p8  ;;  %p854_p12 = scmp.lt.u32.totalorder %s852_s8, %s847_s24 }
  0x53   : > { %p856_p2 = scmp.lt.u32.totalorder %s847_s24, %s1264_s28 }
  0x54   : > { %p850_p13 = pnand %p849_p9, %p848_p11  ;;  %p855_p3 = por %p854_p12, %p853_p10 }
  0x56   : > { %p851_p6 = pneg %p850_p13  ;;  %p857_p5 = por %p856_p2, %p855_p3 }
  0x58   : > { %p858_p4 = pnand %p857_p5, %p851_p6 }
  0x5a   : > { %861 = shalt.err (!%p858_p4)
}
  0x5b   : > { %s862_s26 = scalar_lea.vmem %s1259_s12, 128  ;;  %s1040_s9 = smov [#allocation5]  }
  0x5c   : > { %p863_p11 = scmp.ne.s32.totalorder %s1259_s12, %s862_s26  ;;  %s867_s23 = sshll.u32 %s1040_s9, 4  ;;  %s868_s23 = int_to_ptr.vmem [resolvable:$false] %s867_s23 }
  0x5d   : > { %s869_s29 = scalar_lea.vmem %s868_s23, 256  ;;  %p870_p1 = scmp.lt.s32.totalorder %s1259_s12, %s868_s23 }
  0x5e   : > { %p865_p13 = pnand %p863_p11, %p849_p9  ;;  %p871_p10 = scmp.lt.s32.totalorder %s869_s29, %s862_s26 }
  0x60   : > { %p866_p0 = pneg %p865_p13  ;;  %p872_p12 = por %p871_p10, %p870_p1 }
  0x62   : > { %p873_p3 = pnand %p872_p12, %p866_p0 }
  0x64   : > { %876 = shalt.err (!%p873_p3)
}
  0x65   : > { %s1486_s5 = smov 4   ;;  %s1487_s24 = smov 64  }
  0x66   : > { %703 = dma.hbm_to_vmem [thread:$0]  (!%p1270_p8), %s1264_s28, 128, %s1259_s12, %s1274_s17, %s1487_s24, %s1487_s24, %s1486_s5  }
  0x67   : > { %227 = sbr.rel (%p1212_p7) target bundleno = 889 (0x379), region = 28  ;;  %s229_s2 = sand.u32 (!%p1212_p7), 1, %s1011_s16  }
  0x68   : > { %s646_s4 = sshll.u32 (!%p1212_p7), %s229_s2, 3  ;;  %s230_s8 = scalar_lea.sflag (!%p1212_p7), [#allocation3], %s229_s2 }
  0x69   : > { %s233_s27 = scalar_lea.vmem (!%p1212_p7), [#allocation2], %s646_s4  ;;  %p1488_p1 = scmp.ne.s32.totalorder (!%p1212_p7), %s1471_s30, 0 }
  0x6e   : > { %978 = dma.done.wait (%p1488_p1), %s230_s8, 128  }
  0x6f   : > { %980 = vsyncadd (%p1488_p1), %s230_s8, 4294967168  ;;  %s1313_s7 = sand.u32 1, %s999_s13   ;;  %p1489_p7 = scmp.ne.s32.totalorder %s1480_s15, 0 }
  0x70   : > { %s1316_s12 = sshll.u32 %s1313_s7, 3  ;;  %s239_s11 = scalar_lea.sflag [#allocation6], %s1313_s7 }
  0x71   : > { %s242_s28 = scalar_lea.vmem [#allocation5], %s1316_s12 }
  0x72   : > { %982 = dma.done.wait (%p1489_p7), %s239_s11, 128  }
  0x73   : > { %984 = vsyncadd (%p1489_p7), %s239_s11, 4294967168  ;;  %v1041_v0 = vmov 0.0   ;;  %vm1042_vm0 = vmmov 0   ;;  %vm293_vm1 = vcmask 261120   ;;  %v807_v1 = vld [vmem:[%s242_s28] sm:$0xff]   ;;  %v808_v3 = vld [vmem:[%s233_s27] sm:$0xff]  }
  0x74   : > { %677 = vmatprep.subr.bf16.mxu0 %v1041_v0  ;;  %679 = vmatprep.mubr.msk.bf16.mxu0 %vm1042_vm0, %v1041_v0  ;;  %v298_v2 = vsel %vm293_vm1, %v807_v1, 0  ;;  %vm343_vm2 = vcmask 130048   ;;  %vm374_vm3 = vcmask 125952   ;;  %s274_s30 = scalar_lea.vmem [#allocation8], %s1316_s12  ;;  %s660_s15 = sshll.u32 %s1019_s18, 1 }
  0x75   : > { %683 = vmatprep.subr.bf16.mxu1 %v1041_v0  ;;  %685 = vmatprep.mubr.msk.bf16.mxu1 %vm1042_vm0, %v1041_v0  ;;  %s661_s17 = sshll.u32 %s1023_s19, 2  ;;  %s476_s5 = sshll.u32 %s274_s30, 4  ;;  %s1342_s5 = int_to_ptr.vmem [resolvable:$true] %s476_s5 }
  0x76   : > { %684 = vmatpush3.bf16.msra.mxu1 %v807_v1  ;;  %678 = vmatpush3.bf16.xpose.msra.mxu0 %v298_v2  ;;  %s1332_s10 = sadd.s32 %s661_s17, %s660_s15  ;;  %s439_s24 = scalar_lea.sflag [#allocation9], %s1313_s7 }
  0x77   : > { %s662_s26 = sshll.u32 %s1332_s10, 6  ;;  %s877_s18 = scalar_lea.vmem %s1342_s5, 128 }
  0x78   : > { %s1340_s29 = scalar_lea.hbm %s1448_s3, %s662_s26  ;;  %p878_p0 = scmp.ne.s32.totalorder %s1342_s5, %s877_s18 }
  0x79   : > { %p1490_p4 = scmp.ne.s32.totalorder %s1482_s25, 0  ;;  %s1043_s19 = smov [#allocation8]  }
  0x7a   : > { %s881_s2 = sshll.u32 %s1043_s19, 4  ;;  %s882_s2 = int_to_ptr.vmem [resolvable:$false] %s881_s2 }
  0x7b   : > { %p879_p8 = pnand %p878_p0, %p1490_p4  ;;  %s883_s4 = scalar_lea.vmem %s882_s2, 256 }
  0x7c   : > { %p884_p6 = scmp.lt.s32.totalorder %s1342_s5, %s882_s2  ;;  %p885_p2 = scmp.lt.s32.totalorder %s883_s4, %s877_s18 }
  0x7d   : > { %680 = vmatmul.mubr.msk.bf16.vlgmr.msra.gmra.mrb[0].mxu0 %vm293_vm1, %v808_v3  ;;  %p880_p9 = pneg %p879_p8 }
  0x7e   : > { %p886_p5 = por %p885_p2, %p884_p6 }
  0x80   : > { %p887_p11 = pnand %p886_p5, %p880_p9 }
 0x150   : > { %v334_v4 = vpop.f32.mrb[0].mxu0 }
 0x151   : > { %v341_v5 = vmul.f32 0.17677669, %v334_v4  ;;  %v681_v6 = vpop.f32.mrb[1].mxu0 }
 0x152   : > { %v337_v7 = vpop.f32.mrb[2].mxu0 }
 0x153   : > { %v342_v8 = vmul.f32 0.17677669, %v337_v7  ;;  %v682_v9 = vpop.f32.mrb[3].mxu0  ;;  %v344_v10 = vsel %vm343_vm2, %v341_v5, -inf }
 0x154   : > { %345 = vmax.xlane.f32.xlu0 %v344_v10 }
 0x155   : > { %v347_v11 = vsel %vm343_vm2, %v342_v8, -inf }
 0x158   : > { %348 = vmax.xlane.f32.xlu0 %v347_v11 }
 0x1e1   : > { %v346_v12 = vpop.xlane.xlu0 %345 }
 0x1e2   : > { %v350_v13 = vsub.f32 %v341_v5, %v346_v12 }
 0x1e4   : > { %v352_v14 = vmul.f32 1.442695, %v350_v13 }
 0x1e5   : > { %v349_v15 = vpop.xlane.xlu0 %348 }
 0x1e6   : > { %809 = vpow2.f32 %v352_v14  ;;  %v351_v16 = vsub.f32 %v342_v8, %v349_v15 }
 0x1e8   : > { %v354_v17 = vmul.f32 1.442695, %v351_v16 }
 0x1ea   : > { %811 = vpow2.f32 %v354_v17 }
 0x1f0   : > { %v810_v18 = vpop.eup %809 }
 0x1f1   : > { %v356_v19 = vsel %vm343_vm2, %v810_v18, 0.0 }
 0x1f2   : > { %357 = vadd.xlane.f32.xlu1 %v356_v19 }
 0x1f4   : > { %v812_v20 = vpop.eup %811 }
 0x1f5   : > { %v359_v21 = vsel %vm343_vm2, %v812_v20, 0.0 }
 0x1f6   : > { %360 = vadd.xlane.f32.xlu1 %v359_v21 }
 0x27f   : > { %v358_v22 = vpop.xlane.xlu1 %357 }
 0x280   : > { %813 = vrcp.f32 %v358_v22 }
 0x283   : > { %v361_v23 = vpop.xlane.xlu1 %360 }
 0x284   : > { %815 = vrcp.f32 %v361_v23 }
 0x28a   : > { %v814_v24 = vpop.eup %813 }
 0x28b   : > { %v364_v25 = vmul.f32 %v814_v24, %v810_v18 }
 0x28d   : > { %v669_v26 = vpack.c.bf16 %v364_v25, %v364_v25 }
 0x28e   : > { %v816_v27 = vpop.eup %815 }
 0x28f   : > { %v365_v28 = vmul.f32 %v816_v27, %v812_v20  ;;  %375 = vst.msk [vmem:[%s274_s30] sm:$0xf] %vm374_vm3, %v669_v26 }
 0x291   : > { %v366_v29 = vpack.c.bf16 %v365_v28, %v364_v25  ;;  %v670_v30 = vpack.c.bf16 %v365_v28, %v365_v28 }
 0x293   : > { %686 = vmatmul.mubr.msk.bf16.vlgmr.msra.gmra.mrb[0].mxu1 %vm343_vm2, %v366_v29  ;;  %376 = vst.msk [vmem:[%s274_s30 + $0x4] sm:$0xf] %vm374_vm3, %v670_v30 }
 0x294   : > { %890 = shalt.err (!%p887_p11)
}
 0x295   : > { %s891_s8 = scalar_lea.hbm %s1340_s29, 128  ;;  %s895_s28 = scalar_lea.hbm %s1448_s3, 512 }
 0x296   : > { %p892_p13 = scmp.ne.s32.totalorder %s1340_s29, %s891_s8  ;;  %p896_p3 = scmp.lt.u32.totalorder %s1340_s29, %s1448_s3 }
 0x297   : > { %p897_p1 = scmp.lt.u32.totalorder %s895_s28, %s891_s8  ;;  %p899_p0 = scmp.lt.u32.totalorder %s891_s8, %s1340_s29 }
 0x298   : > { %p893_p10 = pnand %p892_p13, %p1490_p4 }
 0x299   : > { %p898_p7 = por %p897_p1, %p896_p3 }
 0x29a   : > { %p894_p12 = pneg %p893_p10 }
 0x29b   : > { %p900_p8 = por %p899_p0, %p898_p7 }
 0x29d   : > { %p901_p9 = pnand %p900_p8, %p894_p12 }
 0x29f   : > { %904 = shalt.err (!%p901_p9)
}
 0x2a0   : > { %s1044_s17 = smov 64   ;;  %s1045_s9 = smov 4   ;;  %vm430_vm4 = vcmask 257024  }
 0x2a1   : > { %694 = dma.vmem_to_hbm [thread:$0]  (%p1490_p4), %s1342_s5, 128, %s1340_s29, %s439_s24, %s1044_s17, %s1044_s17, %s1045_s9  }
 0x2a2   : > { %s267_s23 = scalar_lea.vmem [#allocation7], %s1316_s12  ;;  %s1491_s29 = sld [smem:[#allocation20_spill]] }
 0x2a3   : > { %s456_s18 = sshll.u32 %s267_s23, 4  ;;  %s434_s5 = scalar_lea.sflag [#allocation4], %s1313_s7  ;;  %s1372_s18 = int_to_ptr.vmem [resolvable:$true] %s456_s18 }
 0x2a4   : > { %s905_s24 = scalar_lea.vmem %s1372_s18, 128  ;;  %s1046_s4 = smov [#allocation7]  }
 0x2a5   : > { %p906_p6 = scmp.ne.s32.totalorder %s1372_s18, %s905_s24  ;;  %s909_s8 = sshll.u32 %s1046_s4, 4  ;;  %s910_s8 = int_to_ptr.vmem [resolvable:$false] %s909_s8 }
 0x2a6   : > { %s911_s27 = scalar_lea.vmem %s910_s8, 256  ;;  %p912_p11 = scmp.lt.s32.totalorder %s1372_s18, %s910_s8 }
 0x2a7   : > { %p907_p2 = pnand %p906_p6, %p1490_p4  ;;  %p913_p13 = scmp.lt.s32.totalorder %s911_s27, %s905_s24 }
 0x2a8   : > { %s1379_s12 = scalar_lea.hbm %s1491_s29, %s662_s26 }
 0x2a9   : > { %p908_p5 = pneg %p907_p2  ;;  %p914_p10 = por %p913_p13, %p912_p11 }
 0x2ab   : > { %p915_p12 = pnand %p914_p10, %p908_p5 }
 0x366   : > { %v415_v31 = vpop.f32.mrb[0].mxu1 }
 0x367   : > { %v671_v32 = vpack.c.bf16 %v415_v31, %v415_v31  ;;  %v687_v33 = vpop.f32.mrb[1].mxu1 }
 0x368   : > { %v418_v34 = vpop.f32.mrb[2].mxu1 }
 0x369   : > { %431 = vst.msk [vmem:[%s267_s23] sm:$0xf] %vm430_vm4, %v671_v32  ;;  %v672_v35 = vpack.c.bf16 %v418_v34, %v418_v34  ;;  %v688_v36 = vpop.f32.mrb[3].mxu1 }
 0x36b   : > { %432 = vst.msk [vmem:[%s267_s23 + $0x4] sm:$0xf] %vm430_vm4, %v672_v35 }
 0x36c   : > { %918 = shalt.err (!%p915_p12)
}
 0x36d   : > { %s919_s10 = scalar_lea.hbm %s1379_s12, 128  ;;  %s923_s28 = scalar_lea.hbm %s1491_s29, 512 }
 0x36e   : > { %p920_p3 = scmp.ne.s32.totalorder %s1379_s12, %s919_s10  ;;  %p924_p0 = scmp.lt.u32.totalorder %s1379_s12, %s1491_s29 }
 0x36f   : > { %p925_p8 = scmp.lt.u32.totalorder %s923_s28, %s919_s10  ;;  %p927_p6 = scmp.lt.u32.totalorder %s919_s10, %s1379_s12 }
 0x370   : > { %p921_p1 = pnand %p920_p3, %p1490_p4 }
 0x371   : > { %p926_p9 = por %p925_p8, %p924_p0 }
 0x372   : > { %p922_p7 = pneg %p921_p1 }
 0x373   : > { %p928_p2 = por %p927_p6, %p926_p9 }
 0x375   : > { %p929_p5 = pnand %p928_p2, %p922_p7 }
 0x377   : > { %932 = shalt.err (!%p929_p5)
}
 0x378   : > { %693 = dma.vmem_to_hbm [thread:$0]  (%p1490_p4), %s1372_s18, 128, %s1379_s12, %s434_s5, %s1044_s17, %s1044_s17, %s1045_s9  }
 0x379 PF: > { %s1492_s23 = sld [smem:[#allocation14_spill]]  ;;  %p712_p11 = scmp.ge.s32.totalorder %s1035_s22, 2 }
 0x37a   : > { %p1493_p13 = scmp.ne.s32.totalorder %s1483_s6, 0 }
 0x37c   : > { %p705_p10 = pnand %p712_p11, %p1493_p13 }
 0x37f   : > { %s491_s19 = sand.u32 1, %s1492_s23  }
 0x380   : > { %s492_s2 = scalar_lea.sflag [#allocation4], %s491_s19 }
 0x381   : > { %986 = dma.done.wait (!%p705_p10), %s492_s2, 128  }
 0x382   : > { %988 = vsyncadd (!%p705_p10), %s492_s2, 4294967168  ;;  %s501_s25 = scalar_lea.sflag [#allocation9], %s491_s19 }
 0x383   : > { %990 = dma.done.wait (!%p705_p10), %s501_s25, 128  }
 0x384   : > { %992 = vsyncadd (!%p705_p10), %s501_s25, 4294967168  ;;  %s26_s22 = sadd.s32 1, %s1035_s22   ;;  %s1494_s7 = sld [smem:[#allocation15_spill]] }
 0x385   : > { %p23_p12 = scmp.ge.s32.totalorder %s26_s22, 6   ;;  %s1495_s17 = sld [smem:[#allocation17_spill]] }
 0x386   : > { %s1496_s9 = sld [smem:[#allocation16_spill]]  ;;  %s1497_s6 = sld [smem:[#allocation18_spill]] }
 0x387   : > { %s1498_s12 = smov %s999_s13  ;;  %s1499_s13 = smov %s1003_s14 }
 0x388   : > { %s1500_s14 = smov %s1256_s0  ;;  %s1501_s15 = smov %s1011_s16 }
 0x389   : > { %s1503_s18 = smov %s1027_s20  ;;  %s1504_s19 = smov %s1031_s21 }
 0x38a   : > { %s1502_s16 = smov %s1494_s7  ;;  %25 = sbr.rel (!%p23_p12) target bundleno = 16 (0x10), region = 103 }
 0x38c   : > { %s1505_s20 = smov %s1496_s9  ;;  %s1506_s21 = smov %s1497_s6 }
 0x391   :  { %506 = vsyncpa [#allocation3], 1 }
 0x392   :  { %508 = vsyncpa [#allocation3 + $0x1], 1 }
 0x393   :  { %509 = vsyncpa [#allocation6], 1 }
 0x394   :  { %511 = vsyncpa [#allocation6 + $0x1], 1 }
 0x395   :  { %512 = vsyncpa [#allocation4], 1 }
 0x396   :  { %514 = vsyncpa [#allocation4 + $0x1], 1 }
 0x397   :  { %515 = vsyncpa [#allocation9], 1 }
 0x398   :  { %517 = vsyncpa [#allocation9 + $0x1], 1 }

</bundles_post_ra>
